<compile_context>
chip_gen: v7x
topology: tpu7x:2x2x1
jax: 0.10.0
libtpu: 0.0.40
codegen_flags: <defaults>
</compile_context>

<pallas_src>
from functools import partial

import numpy as np
import jax
import jax.numpy as jnp
from jax import lax
from jax.experimental import pallas as pl
from jax.experimental.pallas import tpu as pltpu


_VMEM_LIMIT = 32 * 1024 * 1024  # explicit scoped-VMEM cap (safe on v5e/v6e/v7x)


# ----------------------------------------------------------------------------
# Pallas kernels
# ----------------------------------------------------------------------------
def _conv1x1_kernel(x_ref, w_ref, o_ref):
    # x_ref: (1, Cin, T) f32 (NCHW slab, T = spatial tile of H*W)
    # w_ref: (Cin, Cout)  bf16
    # o_ref: (1, T, Cout) bf16  (NHWC layout written directly by the kernel)
    x = x_ref[0].astype(jnp.bfloat16)                       # (Cin, T)
    o = lax.dot_general(x, w_ref[...], (((0,), (0,)), ((), ())),
                        preferred_element_type=jnp.float32)  # (T, Cout)
    o_ref[0] = o.astype(o_ref.dtype)


def _win_attn_masked_kernel(q_ref, kv_ref, idr_ref, idc_ref, o_ref,
                            *, num_heads, scale):
    # q_ref  : (G, N, C)   bf16
    # kv_ref : (G, N, 2C)  bf16  (k | v packed along the lane axis)
    # idr_ref: (G, N, 1)   f32   shift-region id, row orientation
    # idc_ref: (G, 1, N)   f32   shift-region id, column orientation
    # o_ref  : (G, N, C)   bf16
    C = q_ref.shape[-1]
    hd = C // num_heads
    q = q_ref[...]
    kv = kv_ref[...]
    # Build the -100/0 mask in-kernel (VPU compare+select); both id operands
    # are pre-oriented so the broadcast needs no cross-lane relayout.
    mask = jnp.where(idr_ref[...] != idc_ref[...],
                     jnp.float32(-100.0), jnp.float32(0.0))   # (G, N, N)
    # NOTE: heads as static lane slices; for large num_heads a wrapper-side
    # (B_*heads, N, hd) repack may beat the in-kernel slices — not needed here.
    outs = []
    for h in range(num_heads):
        sl = slice(h * hd, (h + 1) * hd)
        qh = q[:, :, sl]
        kh = kv[:, :, sl]
        vh = kv[:, :, C + h * hd:C + (h + 1) * hd]
        s = jnp.einsum('gnd,gmd->gnm', qh, kh,
                       preferred_element_type=jnp.float32) * scale + mask
        s = s - jnp.max(s, axis=-1, keepdims=True)
        p = jnp.exp(s)
        p = p / jnp.sum(p, axis=-1, keepdims=True)
        outs.append(jnp.einsum('gnm,gmd->gnd', p.astype(jnp.bfloat16), vh,
                               preferred_element_type=jnp.float32))
    o = outs[0] if num_heads == 1 else jnp.concatenate(outs, axis=-1)
    o_ref[...] = o.astype(o_ref.dtype)                       # single dense store


def _win_attn_self_kernel(x_ref, o_ref, *, num_heads, scale):
    # shift == 0 branch of the reference module uses k = v = q, so a single
    # input stream suffices and there is no mask.
    # x_ref: (G, N, C) bf16, o_ref: (G, N, C) bf16
    C = x_ref.shape[-1]
    hd = C // num_heads
    x = x_ref[...]
    outs = []
    for h in range(num_heads):
        sl = slice(h * hd, (h + 1) * hd)
        xh = x[:, :, sl]
        s = jnp.einsum('gnd,gmd->gnm', xh, xh,
                       preferred_element_type=jnp.float32) * scale
        s = s - jnp.max(s, axis=-1, keepdims=True)
        p = jnp.exp(s)
        p = p / jnp.sum(p, axis=-1, keepdims=True)
        outs.append(jnp.einsum('gnm,gmd->gnd', p.astype(jnp.bfloat16), xh,
                               preferred_element_type=jnp.float32))
    o = outs[0] if num_heads == 1 else jnp.concatenate(outs, axis=-1)
    o_ref[...] = o.astype(o_ref.dtype)


# ----------------------------------------------------------------------------
# Kernel wrappers
# ----------------------------------------------------------------------------
def _largest_divisor_leq(n, cap):
    cap = max(1, min(n, cap))
    g = 1
    for t in range(1, cap + 1):
        if n % t == 0:
            g = t
    return g


def _pick_hw_tile(hw, cap, want_split):
    # Largest multiple of 128 that divides hw (capped); full extent otherwise.
    if hw % 128 != 0:
        return hw
    limit = min(hw, cap)
    if want_split and hw >= 256:
        limit = min(limit, hw // 2)   # keep >= 2 grid steps for v7x's 2 TCs
    best = 128
    for t in range(128, limit + 1, 128):
        if hw % t == 0:
            best = t
    return best


def conv1x1(x_nchw, w_t, *, tile_cap=2048):
    """1x1 conv, no bias. x: (B, Cin, H, W) f32, w_t: (Cin, Cout) bf16.
    Returns NHWC bf16.  NCHW->NHWC is folded into the kernel (no XLA transpose)."""
    B, Cin, H, W = x_nchw.shape
    Cout = w_t.shape[1]
    HW = H * W
    x_flat = x_nchw.reshape(B, Cin, HW)          # free reshape (metadata only)
    T = _pick_hw_tile(HW, tile_cap, want_split=(B < 2))
    out = pl.pallas_call(
        _conv1x1_kernel,
        out_shape=jax.ShapeDtypeStruct((B, HW, Cout), jnp.bfloat16),
        grid=(B, HW // T),
        in_specs=[
            pl.BlockSpec((1, Cin, T), lambda b, t: (b, 0, t)),
            pl.BlockSpec((Cin, Cout), lambda b, t: (0, 0)),
        ],
        out_specs=pl.BlockSpec((1, T, Cout), lambda b, t: (b, t, 0)),
        compiler_params=pltpu.CompilerParams(
            dimension_semantics=("parallel", "parallel"),
            vmem_limit_bytes=_VMEM_LIMIT),
    )(x_flat, w_t)
    return out.reshape(B, H, W, Cout)


def window_attention_masked(qw, kvw, ids_np, num_heads):
    """qw: (B_, N, C) bf16, kvw: (B_, N, 2C) bf16, ids_np: (nW, N) np.float32."""
    B_, N, C = qw.shape
    nW = ids_np.shape[0]
    B = B_ // nW
    scale = float(C // num_heads) ** -0.5

    cap = 32 if B >= 2 else max(1, nW // 2)      # keep >= 2 total grid steps
    G = _largest_divisor_leq(nW, cap)
    nWg = nW // G

    # Pre-oriented region ids (both broadcasts become cheap in-kernel).
    ids_row = jnp.asarray(ids_np[:, :, None])    # (nW, N, 1) f32
    ids_col = jnp.asarray(ids_np[:, None, :])    # (nW, 1, N) f32

    qkv_map = lambda w, b: (b * nWg + w, 0, 0)
    ids_map = lambda w, b: (w, 0, 0)             # constant along inner axis b

    return pl.pallas_call(
        partial(_win_attn_masked_kernel, num_heads=num_heads, scale=scale),
        out_shape=jax.ShapeDtypeStruct((B_, N, C), jnp.bfloat16),
        grid=(nWg, B),
        in_specs=[
            pl.BlockSpec((G, N, C), qkv_map),
            pl.BlockSpec((G, N, 2 * C), qkv_map),
            pl.BlockSpec((G, N, 1), ids_map),
            pl.BlockSpec((G, 1, N), ids_map),
        ],
        out_specs=pl.BlockSpec((G, N, C), qkv_map),
        compiler_params=pltpu.CompilerParams(
            dimension_semantics=("parallel", "parallel"),
            vmem_limit_bytes=_VMEM_LIMIT),
    )(qw, kvw, ids_row, ids_col)


def window_attention_self(xw, num_heads):
    """xw: (B_, N, C) bf16 — q = k = v (shift==0 branch), no mask."""
    B_, N, C = xw.shape
    scale = float(C // num_heads) ** -0.5
    G = _largest_divisor_leq(B_, min(32, max(1, B_ // 2)))
    spec = pl.BlockSpec((G, N, C), lambda i: (i, 0, 0))
    return pl.pallas_call(
        partial(_win_attn_self_kernel, num_heads=num_heads, scale=scale),
        out_shape=jax.ShapeDtypeStruct((B_, N, C), jnp.bfloat16),
        grid=(B_ // G,),
        in_specs=[spec],
        out_specs=spec,
        compiler_params=pltpu.CompilerParams(
            dimension_semantics=("parallel",),
            vmem_limit_bytes=_VMEM_LIMIT),
    )(xw)


# ----------------------------------------------------------------------------
# Glue (reshapes / rolls / region ids) — bf16, plain JAX / numpy
# ----------------------------------------------------------------------------
def window_partition(x, ws):
    B, H, W, C = x.shape
    x = x.reshape(B, H // ws, ws, W // ws, ws, C)
    return jnp.transpose(x, (0, 1, 3, 2, 4, 5)).reshape(-1, ws, ws, C)


def window_reverse(windows, ws, H, W):
    B = windows.shape[0] // (H * W // ws // ws)
    x = windows.reshape(B, H // ws, W // ws, ws, ws, -1)
    return jnp.transpose(x, (0, 1, 3, 2, 4, 5)).reshape(B, H, W, -1)


def build_shift_region_ids(Hp, Wp, ws, shift):
    """Per-window region ids (nW, N) — static numpy, replaces the (nW,N,N) mask."""
    img = np.zeros((Hp, Wp), dtype=np.float32)
    h_slices = (slice(0, -ws), slice(-ws, -shift), slice(-shift, None))
    w_slices = (slice(0, -ws), slice(-ws, -shift), slice(-shift, None))
    cnt = 0
    for h_ in h_slices:
        for w_ in w_slices:
            img[h_, w_] = cnt
            cnt += 1
    ids = img.reshape(Hp // ws, ws, Wp // ws, ws).transpose(0, 2, 1, 3)
    return ids.reshape(-1, ws * ws)              # (nW, N), window_partition order


def swin_block_shift0(q_nhwc, ws, num_heads, Hp, Wp):
    # Reproduces the reference module's shift==0 branch (k = v = q_out).
    C = q_nhwc.shape[-1]
    N = ws * ws
    qw = window_partition(q_nhwc, ws).reshape(-1, N, C)
    attn = window_attention_self(qw, num_heads)              # (B_, N, C) bf16
    attn = attn.reshape(-1, ws, ws, C)
    return window_reverse(attn, ws, Hp, Wp)


def swin_block_shifted(q_nhwc, kv_nhwc, ws, shift, num_heads, Hp, Wp):
    C = q_nhwc.shape[-1]
    N = ws * ws
    sq = jnp.roll(q_nhwc, (-shift, -shift), axis=(1, 2))
    skv = jnp.roll(kv_nhwc, (-shift, -shift), axis=(1, 2))
    qw = window_partition(sq, ws).reshape(-1, N, C)
    kvw = window_partition(skv, ws).reshape(-1, N, 2 * C)
    ids = build_shift_region_ids(Hp, Wp, ws, shift)          # (nW, N) np.f32
    attn = window_attention_masked(qw, kvw, ids, num_heads)
    attn = attn.reshape(-1, ws, ws, C)
    x = window_reverse(attn, ws, Hp, Wp)
    return jnp.roll(x, (shift, shift), axis=(1, 2))


def swin_transformer_forward(x_low, x_high, wq, wk, wv, window_size, num_heads):
    B, C, H, W = x_low.shape
    ws = window_size
    pad_h = (ws - H % ws) % ws
    pad_w = (ws - W % ws) % ws

    # NOTE: the attention scale cannot be folded into wq because the shift==0
    # block reuses q_out as k and v (reference-module behavior).
    wq_t = jnp.transpose(wq).astype(jnp.bfloat16)                             # (Cin, C)
    wkv_t = jnp.concatenate(
        [jnp.transpose(wk), jnp.transpose(wv)], axis=1).astype(jnp.bfloat16)  # (Cin, 2C)

    q = conv1x1(x_low, wq_t)       # (B, H, W, C)  NHWC bf16
    kv = conv1x1(x_high, wkv_t)    # (B, Hh, Wh, 2C) NHWC bf16 (k | v packed)

    if pad_h or pad_w:
        q = jnp.pad(q, ((0, 0), (0, pad_h), (0, pad_w), (0, 0)))
    Hh, Wh = kv.shape[1], kv.shape[2]
    pad_hh = (ws - Hh % ws) % ws
    pad_wh = (ws - Wh % ws) % ws
    if pad_hh or pad_wh:
        kv = jnp.pad(kv, ((0, 0), (0, pad_hh), (0, pad_wh), (0, 0)))
    # TODO(synk): like the torch module, q and kv window grids only agree when
    # x_high has the same spatial resolution as x_low.

    Hp, Wp = H + pad_h, W + pad_w
    shift = ws // 2
    x1 = swin_block_shift0(q, ws, num_heads, Hp, Wp)
    if shift > 0:
        x2 = swin_block_shifted(q, kv, ws, shift, num_heads, Hp, Wp)
    else:
        x2 = x1   # torch B2 with shift==0 also degenerates to the q-only branch
    x = (x1.astype(jnp.float32) + x2.astype(jnp.float32)) * 0.5
    x = x.reshape(B, Hp, Wp, C)    # matches torch .view (requires Cout == Cin)
    if pad_h or pad_w:
        x = x[:, :H, :W, :]
    return jnp.transpose(x, (0, 3, 1, 2))  # back to NCHW, f32


# ----------------------------------------------------------------------------
if __name__ == "__main__":
    # Small config consistent with the module (in_channels == out_channels).
    B, C, H, W = 2, 32, 16, 16
    window_size = 4
    num_heads = 2

    key = jax.random.PRNGKey(0)
    k1, k2, k3, k4, k5 = jax.random.split(key, 5)

    x_low = jax.random.normal(k1, (B, C, H, W), jnp.float32)
    x_high = jax.random.normal(k2, (B, C, H, W), jnp.float32)

    # Deterministic parameter init (1x1 conv weights, no bias).
    # kaiming_normal_(mode='fan_out', relu): std = sqrt(2 / fan_out)
    fan_out = C  # Cout * 1 * 1
    std = float(np.sqrt(2.0 / fan_out))
    wq = std * jax.random.normal(k3, (C, C), jnp.float32)  # (Cout, Cin)
    wk = std * jax.random.normal(k4, (C, C), jnp.float32)
    wv = (1.0 / np.sqrt(C)) * jax.random.normal(k5, (C, C), jnp.float32)
    # TODO(synk): relative_position_bias_table exists in __init__ but is unused
    # in forward (position_emd=False), so it is not materialized here.

    out = swin_transformer_forward(x_low, x_high, wq, wk, wv,
                                   window_size, num_heads)
    jax.block_until_ready(out)
    assert out.shape == (B, C, H, W), out.shape
    print("KERNEL_OK")
</pallas_src>

<mosaic_0001>
module attributes {stable_mosaic.version = 11 : i64} {
  func.func @_conv1x1_kernel(%arg0: i32, %arg1: i32, %arg2: memref<1x32x256xf32, #tpu.memory_space<vmem>>, %arg3: memref<32x32xbf16, #tpu.memory_space<vmem>>, %arg4: memref<1x256x32xbf16, #tpu.memory_space<vmem>>) attributes {dimension_semantics = [#tpu.dimension_semantics<parallel>, #tpu.dimension_semantics<parallel>], iteration_bounds = array<i64: 2, 1>, scalar_prefetch = 0 : i64, scratch_operands = 0 : i64, tpu.core_type = #tpu.core_type<tc>, window_params = [{transform_indices = @transform_0, window_bounds = array<i64: 1, 32, 256>}, {pipeline_mode = #tpu.pipeline_mode<synchronous>, transform_indices = @transform_1, window_bounds = array<i64: 32, 32>}, {transform_indices = @transform_2, window_bounds = array<i64: 1, 256, 32>}]} {
    %c0 = arith.constant 0 : index
    %c0_0 = arith.constant 0 : index
    %c0_1 = arith.constant 0 : index
    %0 = vector.load %arg2[%c0, %c0_0, %c0_1] : memref<1x32x256xf32, #tpu.memory_space<vmem>>, vector<1x32x256xf32>
    %1 = vector.shape_cast %0 : vector<1x32x256xf32> to vector<32x256xf32>
    %2 = arith.truncf %1 : vector<32x256xf32> to vector<32x256xbf16>
    %c0_2 = arith.constant 0 : index
    %c0_3 = arith.constant 0 : index
    %3 = vector.load %arg3[%c0_2, %c0_3] : memref<32x32xbf16, #tpu.memory_space<vmem>>, vector<32x32xbf16>
    %cst = arith.constant dense<0.000000e+00> : vector<256x32xf32>
    %4 = tpu.matmul %2, %3, %cst {dimension_numbers = #tpu.dot_dimension_numbers<[0], [0], [1], [1], [0, 1, 1, 1], [], []>} : vector<32x256xbf16>, vector<32x32xbf16>, vector<256x32xf32> -> vector<256x32xf32>
    %5 = arith.truncf %4 : vector<256x32xf32> to vector<256x32xbf16>
    %c0_4 = arith.constant 0 : index
    %c0_5 = arith.constant 0 : index
    %c0_6 = arith.constant 0 : index
    %6 = vector.load %arg4[%c0_4, %c0_5, %c0_6] : memref<1x256x32xbf16, #tpu.memory_space<vmem>>, vector<1x256x32xbf16>
    %7 = vector.shape_cast %6 : vector<1x256x32xbf16> to vector<256x32xbf16>
    %8 = vector.shape_cast %5 : vector<256x32xbf16> to vector<1x256x32xbf16>
    tpu.vector_store %arg4[%c0_4, %c0_5, %c0_6], %8 {strides = array<i32>} : memref<1x256x32xbf16, #tpu.memory_space<vmem>>, vector<1x256x32xbf16>,
    return
  }
  func.func @transform_0(%arg0: i32, %arg1: i32) -> (i32, i32, i32) {
    %c0_i32 = arith.constant 0 : i32
    %c0_i32_0 = arith.constant 0 : i32
    return %arg0, %c0_i32, %arg1 : i32, i32, i32
  }
  func.func @transform_1(%arg0: i32, %arg1: i32) -> (i32, i32) {
    %c0_i32 = arith.constant 0 : i32
    %c0_i32_0 = arith.constant 0 : i32
    %c0_i32_1 = arith.constant 0 : i32
    return %c0_i32, %c0_i32_0 : i32, i32
  }
  func.func @transform_2(%arg0: i32, %arg1: i32) -> (i32, i32, i32) {
    %c0_i32 = arith.constant 0 : i32
    %c0_i32_0 = arith.constant 0 : i32
    return %arg0, %arg1, %c0_i32 : i32, i32, i32
  }
}

</mosaic_0001>

<bundles_post_ra>
// kernel: tpu_custom_call.1
= control target key start
LH: loop header
LB: loop body
LE: loop exit
PB: predicated region body
PF: predicated region fallthrough
CT: control target
= control target key end

     0   :  { %7 = vsyncpa [#allocation3], 0  ;;  %s1349_s0 = inlined_call_operand.hbm [shape: f32[2,32,256], index: 0, kind: input, shape index: {}]   ;;  %s1350_s1 = inlined_call_operand.hbm [shape: bf16[32,32], index: 1, kind: input, shape index: {}]   ;;  %s1351_s2 = inlined_call_operand.vmem [shape: bf16[2,256,32], index: 2, kind: output, shape index: {}]  }
   0x1   :  { %9 = vsyncpa [#allocation3 + $0x1], 0 }
   0x2   :  { %10 = vsyncpa [#allocation5], 0  ;;  %s1109_s9 = smov 0   ;;  %s1111_s10 = smov 0  }
   0x3   :  { %s1113_s11 = smov 0   ;;  %s1115_s12 = smov 0  }
   0x4   :  { %s1117_s13 = smov 0   ;;  %s1119_s14 = smov 0  }
   0x5 LB: > { %s744_s15 = sadd.s32 4294967295, %s1086_s14   ;;  %p50_p0 = scmp.ne.s32.totalorder %s1070_s10, %s1066_s9  ;;  %s1086_s14 = sphi %s1119_s14, %s16_s14   ;;  %s1082_s13 = sphi %s1117_s13, %s1368_s13   ;;  %s1078_s12 = sphi %s1115_s12, %s1367_s12   ;;  %s1074_s11 = sphi %s1113_s11, %s1366_s11   ;;  %s1070_s10 = sphi %s1111_s10, %s1365_s10   ;;  %s1066_s9 = sphi %s1109_s9, %s1364_s9  }
   0x6   : > { %p1139_p1 = scmp.eq.s32.totalorder %s744_s15, 0  ;;  %p746_p2 = scmp.ge.s32.totalorder %s1086_s14, 1 }
   0x7   : > { %p110_p3 = scmp.lt.s32.totalorder %s1086_s14, 3  ;;  %s1088_s19 = smov [#allocation4]  }
   0x8   : > { %s1356_s16 = scalar_select %p1139_p1, 1, 0 }
   0x9   : > { %p1147_p4 = por %p1139_p1, %p50_p0  ;;  %p1151_p5 = pnand %p746_p2, %p110_p3 }
   0xa   : > { %s122_s20 = sshll.u32 %s1088_s19, 4  ;;  %s28_s22 = sadd.s32 1, %s1082_s13  ;;  %s123_s20 = int_to_ptr.vmem [resolvable:$true] %s122_s20 }
   0xb   : > { %s1357_s17 = scalar_select %p1147_p4, 1, 0 }
   0xc   : > { %s1358_s18 = scalar_select %p1151_p5, 1, 0 }
   0xd   : > { %p907_p6 = pneg %p1151_p5  ;;  %s974_s25 = scalar_lea.hbm %s1350_s1, 256 }
   0xe   : > { %p975_p8 = scmp.ne.s32.totalorder %s1350_s1, %s974_s25  ;;  %p981_p12 = scmp.lt.u32.totalorder %s974_s25, %s1350_s1 }
   0xf   : > { %p1159_p7 = pnand %p907_p6, %p1139_p1 }
  0x11   : > { %p976_p9 = pneg %p1159_p7 }
  0x13   : > { %p977_p10 = pnand %p976_p9, %p975_p8 }
  0x15   : > { %p978_p11 = pneg %p977_p10 }
  0x17   : > { %p983_p13 = pnand %p981_p12, %p978_p11 }
  0x19   : > { %986 = shalt.err (!%p983_p13)
}
  0x1a   : > { %s987_s30 = scalar_lea.vmem %s123_s20, 256  ;;  %p995_p6 = scmp.lt.s32.totalorder %s123_s20, %s123_s20 }
  0x1b   : > { %p988_p0 = scmp.ne.s32.totalorder %s123_s20, %s987_s30  ;;  %p996_p1 = scmp.lt.s32.totalorder %s987_s30, %s987_s30 }
  0x1d   : > { %p990_p2 = pnand %p988_p0, %p976_p9  ;;  %p997_p4 = por %p996_p1, %p995_p6 }
  0x1f   : > { %p991_p3 = pneg %p990_p2 }
  0x21   : > { %p998_p5 = pnand %p997_p4, %p991_p3 }
  0x23   : > { %1001 = shalt.err (!%p998_p5)
}
  0x24   : > { %s1089_s3 = smov 64   ;;  %s1090_s4 = smov 4  }
  0x25   : > { %910 = dma.hbm_to_vmem [thread:$0]  (!%p1159_p7), %s1350_s1, 256, %s123_s20, [#allocation5], %s1089_s3, %s1089_s3, %s1090_s4  }
  0x26   : > { %p30_p1 = scmp.ge.s32.totalorder %s28_s22, 2  ;;  %s37_s7 = sadd.s32 1, %s1074_s11 }
  0x27   : > { %p44_p4 = scmp.ne.s32.totalorder %s1074_s11, %s1070_s10  ;;  %p45_p5 = scmp.eq.s32.totalorder %s1086_s14, 0 }
  0x28   : > { %s1370_s22 = smov (%p30_p1, %s28_s22), 0  ;;  %p916_p9 = scmp.lt.s32.totalorder %s1086_s14, 2 }
  0x29   : > { %p46_p8 = por %p45_p5, %p44_p4  ;;  %s32_s8 = ssub.s32 %s1082_s13, %s1370_s22 }
  0x2a   : > { %s136_s9 = sand.u32 1, %s1074_s11   ;;  %p35_p10 = scmp.eq.s32.totalorder %s32_s8, 0 }
  0x2b   : > { %s749_s15 = sshll.u32 %s136_s9, 6  ;;  %s809_s19 = sshll.u32 %s1082_s13, 10 }
  0x2c   : > { %s1192_s23 = scalar_select %p35_p10, %s1074_s11, %s37_s7  }
  0x2d   : > { %s1197_s20 = scalar_lea.hbm %s1349_s0, %s809_s19  ;;  %s140_s25 = scalar_lea.vmem [#allocation2], %s749_s15 }
  0x2e   : > { %s149_s26 = sshll.u32 %s140_s25, 4  ;;  %p1199_p7 = pnand %p916_p9, %p46_p8  ;;  %s1203_s26 = int_to_ptr.vmem [resolvable:$true] %s149_s26 }
  0x2f   : > { %s1205_s28 = scalar_lea.sflag [#allocation3], %s136_s9  ;;  %s1002_s29 = scalar_lea.hbm %s1197_s20, 1024 }
  0x30   : > { %p1003_p11 = scmp.ne.s32.totalorder %s1197_s20, %s1002_s29  ;;  %p1004_p12 = pneg %p1199_p7 }
  0x31   : > { %s1007_s4 = scalar_lea.hbm %s1349_s0, 2048  ;;  %p1008_p2 = scmp.lt.u32.totalorder %s1197_s20, %s1349_s0 }
  0x32   : > { %p1005_p13 = pnand %p1004_p12, %p1003_p11  ;;  %p1009_p3 = scmp.lt.u32.totalorder %s1007_s4, %s1002_s29 }
  0x33   : > { %p1011_p1 = scmp.lt.u32.totalorder %s1002_s29, %s1197_s20 }
  0x34   : > { %p1006_p0 = pneg %p1005_p13  ;;  %p1010_p6 = por %p1009_p3, %p1008_p2 }
  0x36   : > { %p1012_p4 = por %p1011_p1, %p1010_p6 }
  0x38   : > { %p1013_p5 = pnand %p1012_p4, %p1006_p0 }
  0x3a   : > { %1016 = shalt.err (!%p1013_p5)
}
  0x3b   : > { %s1017_s7 = scalar_lea.vmem %s1203_s26, 1024  ;;  %s1091_s8 = smov [#allocation2]  }
  0x3c   : > { %p1018_p8 = scmp.ne.s32.totalorder %s1203_s26, %s1017_s7  ;;  %s1022_s9 = sshll.u32 %s1091_s8, 4  ;;  %s1023_s9 = int_to_ptr.vmem [resolvable:$false] %s1022_s9 }
  0x3d   : > { %s1024_s15 = scalar_lea.vmem %s1023_s9, 2048  ;;  %p1025_p11 = scmp.lt.s32.totalorder %s1203_s26, %s1023_s9 }
  0x3e   : > { %p1020_p9 = pnand %p1018_p8, %p1004_p12  ;;  %p1026_p13 = scmp.lt.s32.totalorder %s1024_s15, %s1017_s7 }
  0x40   : > { %p1021_p10 = pneg %p1020_p9  ;;  %p1027_p2 = por %p1026_p13, %p1025_p11 }
  0x42   : > { %p1028_p3 = pnand %p1027_p2, %p1021_p10 }
  0x44   : > { %1031 = shalt.err (!%p1028_p3)
}
  0x45   : > { %s1092_s19 = smov 256   ;;  %s1093_s21 = smov 16  }
  0x46   : > { %914 = dma.hbm_to_vmem [thread:$0]  (!%p1199_p7), %s1197_s20, 1024, %s1203_s26, %s1205_s28, %s1092_s19, %s1092_s19, %s1093_s21  }
  0x47   : > { %p1361_p12 = scmp.ne.s32.totalorder %s1358_s18, 0 }
  0x48   : > { %s163_s24 = sand.u32 (!%p1361_p12), 1, %s1070_s10   ;;  %p1362_p0 = scmp.ne.s32.totalorder (!%p1361_p12), %s1357_s17, 0 }
  0x49   : > { %161 = sbr.rel (%p1361_p12) target bundleno = 437 (0x1b5), region = 28  ;;  %s753_s25 = sshll.u32 (!%p1361_p12), %s163_s24, 6 }
  0x4a   : > { %s164_s29 = scalar_lea.sflag (!%p1361_p12), [#allocation3], %s163_s24  ;;  %s167_s30 = scalar_lea.vmem (!%p1361_p12), [#allocation2], %s753_s25 }
  0x50   : > { %1057 = dma.done.wait (%p1362_p0), %s164_s29, 1024  }
  0x51   : > { %1059 = vsyncadd (%p1362_p0), %s164_s29, 4294966272  ;;  %p1363_p6 = scmp.ne.s32.totalorder %s1356_s16, 0 }
  0x53   : > { %1061 = dma.done.wait (%p1363_p6), [#allocation5], 256  }
  0x54   : > { %1063 = vsyncadd (%p1363_p6), [#allocation5], 4294967040  ;;  %v209_v0 = vld [vmem:[%s167_s30 + $0x8] sm:$0xff]  ;;  %v211_v1 = vld [vmem:[%s167_s30 + $0x18] sm:$0xff]  ;;  %vm268_vm0 = vcmask 261120   ;;  %p198_p7 = scmp.lt.s32.totalorder %s1078_s12, 1 }
  0x55   : > { %v208_v2 = vld [vmem:[%s167_s30] sm:$0xff]  ;;  %v217_v3 = vpack.c.bf16 %v211_v1, %v209_v0  ;;  %v210_v4 = vld [vmem:[%s167_s30 + $0x10] sm:$0xff]  ;;  %v213_v5 = vld [vmem:[%s167_s30 + $0x28] sm:$0xff]  ;;  %vm606_vm1 = vcmask 257024  }
  0x56   : > { %v215_v6 = vld [vmem:[%s167_s30 + $0x38] sm:$0xff]  ;;  %v216_v7 = vpack.c.bf16 %v210_v4, %v208_v2  ;;  %v212_v8 = vld [vmem:[%s167_s30 + $0x20] sm:$0xff]  ;;  %v214_v9 = vld [vmem:[%s167_s30 + $0x30] sm:$0xff]  ;;  %s1372_s12 = smov (!%p198_p7, %s1078_s12), 1 }
  0x57   : > { %240 = vxpose.xlu1.c.b16.start [1/2] (short) %v217_v3, 128  ;;  %v219_v10 = vpack.c.bf16 %v215_v6, %v213_v5  ;;  %v972_v11 = vld [vmem:[#allocation4] sm:$0xff]   ;;  %v218_v12 = vpack.c.bf16 %v214_v9, %v212_v8  ;;  %v973_v13 = vld [vmem:[#allocation4 + $0x8] sm:$0xff]   ;;  %s810_s16 = sshll.u32 %s1372_s12, 7 }
  0x58   : > { %224 = vxpose.xlu0.c.b16.start [1/2] (short) %v216_v7, 128  ;;  %861 = vmatprep.subr.bf16.mxu0 %v972_v11  ;;  %s1265_s20 = scalar_lea.vmem %s1351_s2, %s810_s16 }
  0x59   : > { %897 = vmatprep.subr.bf16.mxu1 %v972_v11  ;;  %862 = vmatpush3.bf16.msra.mxu0 %v972_v11 }
  0x5a   : > { %899 = vmatpush3.bf16.msra.mxu1 %v972_v11  ;;  %863 = vmatprep.subr.bf16.mxu0 %v973_v13 }
  0x5b   : > { %241 = vxpose.xlu1.c.b16.end [2/2] (short) %v219_v10, 128  ;;  %898 = vmatprep.subr.bf16.mxu1 %v973_v13 }
  0x5c   : > { %225 = vxpose.xlu0.c.b16.end [2/2] (short) %v218_v12, 128 }
  0x5d   : > { %864 = vmatpush3.bf16.msra.mxu0 %v973_v13 }
  0x5e   : > { %900 = vmatpush3.bf16.msra.mxu1 %v973_v13 }
  0xbd   : > { %v248_v14 = vpop.trf.xlu1 }
  0xbe   : > { %v232_v15 = vpop.trf.xlu0  ;;  %881 = vmatprep.mubr.msk.bf16.mxu1 %vm268_vm0, %v248_v14 }
  0xbf   : > { %865 = vmatprep.mubr.msk.bf16.mxu0 %vm268_vm0, %v232_v15 }
  0xc1   : > { %v249_v16 = vpop.trf.xlu1 }
  0xc2   : > { %v233_v17 = vpop.trf.xlu0  ;;  %882 = vmatmul.mubr.msk.bf16.vlgmr.msra.gmra.mrb[0].mxu1 %vm268_vm0, %v249_v16 }
  0xc3   : > { %866 = vmatmul.mubr.msk.bf16.vlgmr.msra.gmra.mrb[0].mxu0 %vm268_vm0, %v233_v17 }
  0xc5   : > { %v250_v18 = vpop.trf.xlu1 }
  0xc6   : > { %v234_v19 = vpop.trf.xlu0  ;;  %885 = vmatprep.mubr.msk.bf16.mxu1 %vm268_vm0, %v250_v18 }
  0xc7   : > { %869 = vmatprep.mubr.msk.bf16.mxu0 %vm268_vm0, %v234_v19 }
  0xc9   : > { %v251_v20 = vpop.trf.xlu1 }
  0xca   : > { %v235_v21 = vpop.trf.xlu0  ;;  %886 = vmatmul.mubr.msk.bf16.gmra.mrb[4].mxu1 %vm268_vm0, %v251_v20 }
  0xcb   : > { %870 = vmatmul.mubr.msk.bf16.gmra.mrb[4].mxu0 %vm268_vm0, %v235_v21 }
  0xcd   : > { %v252_v22 = vpop.trf.xlu1 }
  0xce   : > { %v236_v23 = vpop.trf.xlu0  ;;  %889 = vmatprep.mubr.msk.bf16.mxu1 %vm268_vm0, %v252_v22 }
  0xcf   : > { %873 = vmatprep.mubr.msk.bf16.mxu0 %vm268_vm0, %v236_v23 }
  0xd1   : > { %v253_v24 = vpop.trf.xlu1 }
  0xd2   : > { %v237_v25 = vpop.trf.xlu0  ;;  %890 = vmatmul.mubr.msk.bf16.gmra.mrb[8].mxu1 %vm268_vm0, %v253_v24 }
  0xd3   : > { %874 = vmatmul.mubr.msk.bf16.gmra.mrb[8].mxu0 %vm268_vm0, %v237_v25 }
  0xd5   : > { %v254_v26 = vpop.trf.xlu1 }
  0xd6   : > { %v238_v27 = vpop.trf.xlu0  ;;  %893 = vmatprep.mubr.msk.bf16.mxu1 %vm268_vm0, %v254_v26 }
  0xd7   : > { %877 = vmatprep.mubr.msk.bf16.mxu0 %vm268_vm0, %v238_v27 }
  0xd9   : > { %v255_v28 = vpop.trf.xlu1 }
  0xda   : > { %v239_v29 = vpop.trf.xlu0  ;;  %894 = vmatmul.mubr.msk.bf16.gmra.mrb[12].mxu1 %vm268_vm0, %v255_v28 }
  0xdb   : > { %878 = vmatmul.mubr.msk.bf16.gmra.mrb[12].mxu0 %vm268_vm0, %v239_v29 }
 0x195   : > { %v883_v30 = vpop.f32.mrb[0].mxu1 }
 0x196   : > { %v867_v31 = vpop.f32.mrb[0].mxu0  ;;  %v829_v32 = vpack.c.bf16 %v883_v30, %v883_v30  ;;  %v415_v33 = vpop.f32.mrb[1].mxu1 }
 0x197   : > { %v813_v34 = vpack.c.bf16 %v867_v31, %v867_v31  ;;  %v351_v35 = vpop.f32.mrb[1].mxu0  ;;  %v827_v36 = vpack.c.bf16 %v415_v33, %v415_v33  ;;  %v884_v37 = vpop.f32.mrb[2].mxu1 }
 0x198   : > { %625 = vst.msk [vmem:[%s1265_s20 + $0x48] sm:$0xf] %vm606_vm1, %v829_v32  ;;  %v811_v38 = vpack.c.bf16 %v351_v35, %v351_v35  ;;  %v868_v39 = vpop.f32.mrb[2].mxu0  ;;  %v830_v40 = vpack.c.bf16 %v884_v37, %v884_v37  ;;  %v418_v41 = vpop.f32.mrb[3].mxu1 }
 0x199   : > { %609 = vst.msk [vmem:[%s1265_s20 + $0x8] sm:$0xf] %vm606_vm1, %v813_v34  ;;  %623 = vst.msk [vmem:[%s1265_s20 + $0x40] sm:$0xf] %vm606_vm1, %v827_v36  ;;  %v814_v42 = vpack.c.bf16 %v868_v39, %v868_v39  ;;  %v354_v43 = vpop.f32.mrb[3].mxu0  ;;  %v828_v44 = vpack.c.bf16 %v418_v41, %v418_v41 }
 0x19a   : > { %607 = vst.msk [vmem:[%s1265_s20] sm:$0xf] %vm606_vm1, %v811_v38  ;;  %626 = vst.msk [vmem:[%s1265_s20 + $0x4c] sm:$0xf] %vm606_vm1, %v830_v40  ;;  %v812_v45 = vpack.c.bf16 %v354_v43, %v354_v43 }
 0x19b   : > { %610 = vst.msk [vmem:[%s1265_s20 + $0xc] sm:$0xf] %vm606_vm1, %v814_v42  ;;  %624 = vst.msk [vmem:[%s1265_s20 + $0x44] sm:$0xf] %vm606_vm1, %v828_v44 }
 0x19c   : > { %608 = vst.msk [vmem:[%s1265_s20 + $0x4] sm:$0xf] %vm606_vm1, %v812_v45 }
 0x19d   : > { %v887_v46 = vpop.f32.mrb[4].mxu1 }
 0x19e   : > { %v871_v47 = vpop.f32.mrb[4].mxu0  ;;  %v833_v48 = vpack.c.bf16 %v887_v46, %v887_v46  ;;  %v431_v49 = vpop.f32.mrb[5].mxu1 }
 0x19f   : > { %v817_v50 = vpack.c.bf16 %v871_v47, %v871_v47  ;;  %v367_v51 = vpop.f32.mrb[5].mxu0  ;;  %v831_v52 = vpack.c.bf16 %v431_v49, %v431_v49  ;;  %v888_v53 = vpop.f32.mrb[6].mxu1 }
 0x1a0   : > { %629 = vst.msk [vmem:[%s1265_s20 + $0x58] sm:$0xf] %vm606_vm1, %v833_v48  ;;  %v815_v54 = vpack.c.bf16 %v367_v51, %v367_v51  ;;  %v872_v55 = vpop.f32.mrb[6].mxu0  ;;  %v834_v56 = vpack.c.bf16 %v888_v53, %v888_v53  ;;  %v434_v57 = vpop.f32.mrb[7].mxu1 }
 0x1a1   : > { %613 = vst.msk [vmem:[%s1265_s20 + $0x18] sm:$0xf] %vm606_vm1, %v817_v50  ;;  %627 = vst.msk [vmem:[%s1265_s20 + $0x50] sm:$0xf] %vm606_vm1, %v831_v52  ;;  %v818_v58 = vpack.c.bf16 %v872_v55, %v872_v55  ;;  %v370_v59 = vpop.f32.mrb[7].mxu0  ;;  %v832_v60 = vpack.c.bf16 %v434_v57, %v434_v57 }
 0x1a2   : > { %611 = vst.msk [vmem:[%s1265_s20 + $0x10] sm:$0xf] %vm606_vm1, %v815_v54  ;;  %630 = vst.msk [vmem:[%s1265_s20 + $0x5c] sm:$0xf] %vm606_vm1, %v834_v56  ;;  %v816_v61 = vpack.c.bf16 %v370_v59, %v370_v59 }
 0x1a3   : > { %614 = vst.msk [vmem:[%s1265_s20 + $0x1c] sm:$0xf] %vm606_vm1, %v818_v58  ;;  %628 = vst.msk [vmem:[%s1265_s20 + $0x54] sm:$0xf] %vm606_vm1, %v832_v60 }
 0x1a4   : > { %612 = vst.msk [vmem:[%s1265_s20 + $0x14] sm:$0xf] %vm606_vm1, %v816_v61 }
 0x1a5   : > { %v891_v62 = vpop.f32.mrb[8].mxu1 }
 0x1a6   : > { %v875_v63 = vpop.f32.mrb[8].mxu0  ;;  %v837_v0 = vpack.c.bf16 %v891_v62, %v891_v62  ;;  %v447_v1 = vpop.f32.mrb[9].mxu1 }
 0x1a7   : > { %v821_v2 = vpack.c.bf16 %v875_v63, %v875_v63  ;;  %v383_v3 = vpop.f32.mrb[9].mxu0  ;;  %v835_v4 = vpack.c.bf16 %v447_v1, %v447_v1  ;;  %v892_v5 = vpop.f32.mrb[10].mxu1 }
 0x1a8   : > { %633 = vst.msk [vmem:[%s1265_s20 + $0x68] sm:$0xf] %vm606_vm1, %v837_v0  ;;  %v819_v6 = vpack.c.bf16 %v383_v3, %v383_v3  ;;  %v876_v7 = vpop.f32.mrb[10].mxu0  ;;  %v838_v8 = vpack.c.bf16 %v892_v5, %v892_v5  ;;  %v450_v9 = vpop.f32.mrb[11].mxu1 }
 0x1a9   : > { %617 = vst.msk [vmem:[%s1265_s20 + $0x28] sm:$0xf] %vm606_vm1, %v821_v2  ;;  %631 = vst.msk [vmem:[%s1265_s20 + $0x60] sm:$0xf] %vm606_vm1, %v835_v4  ;;  %v822_v10 = vpack.c.bf16 %v876_v7, %v876_v7  ;;  %v386_v11 = vpop.f32.mrb[11].mxu0  ;;  %v836_v12 = vpack.c.bf16 %v450_v9, %v450_v9 }
 0x1aa   : > { %615 = vst.msk [vmem:[%s1265_s20 + $0x20] sm:$0xf] %vm606_vm1, %v819_v6  ;;  %634 = vst.msk [vmem:[%s1265_s20 + $0x6c] sm:$0xf] %vm606_vm1, %v838_v8  ;;  %v820_v13 = vpack.c.bf16 %v386_v11, %v386_v11 }
 0x1ab   : > { %618 = vst.msk [vmem:[%s1265_s20 + $0x2c] sm:$0xf] %vm606_vm1, %v822_v10  ;;  %632 = vst.msk [vmem:[%s1265_s20 + $0x64] sm:$0xf] %vm606_vm1, %v836_v12 }
 0x1ac   : > { %616 = vst.msk [vmem:[%s1265_s20 + $0x24] sm:$0xf] %vm606_vm1, %v820_v13 }
 0x1ad   : > { %v895_v14 = vpop.f32.mrb[12].mxu1 }
 0x1ae   : > { %v879_v15 = vpop.f32.mrb[12].mxu0  ;;  %v841_v16 = vpack.c.bf16 %v895_v14, %v895_v14  ;;  %v463_v17 = vpop.f32.mrb[13].mxu1 }
 0x1af   : > { %v825_v18 = vpack.c.bf16 %v879_v15, %v879_v15  ;;  %v399_v19 = vpop.f32.mrb[13].mxu0  ;;  %v839_v20 = vpack.c.bf16 %v463_v17, %v463_v17  ;;  %v896_v21 = vpop.f32.mrb[14].mxu1 }
 0x1b0   : > { %637 = vst.msk [vmem:[%s1265_s20 + $0x78] sm:$0xf] %vm606_vm1, %v841_v16  ;;  %v823_v22 = vpack.c.bf16 %v399_v19, %v399_v19  ;;  %v880_v23 = vpop.f32.mrb[14].mxu0  ;;  %v842_v24 = vpack.c.bf16 %v896_v21, %v896_v21  ;;  %v466_v25 = vpop.f32.mrb[15].mxu1 }
 0x1b1   : > { %621 = vst.msk [vmem:[%s1265_s20 + $0x38] sm:$0xf] %vm606_vm1, %v825_v18  ;;  %635 = vst.msk [vmem:[%s1265_s20 + $0x70] sm:$0xf] %vm606_vm1, %v839_v20  ;;  %v826_v26 = vpack.c.bf16 %v880_v23, %v880_v23  ;;  %v402_v27 = vpop.f32.mrb[15].mxu0  ;;  %v840_v28 = vpack.c.bf16 %v466_v25, %v466_v25 }
 0x1b2   : > { %619 = vst.msk [vmem:[%s1265_s20 + $0x30] sm:$0xf] %vm606_vm1, %v823_v22  ;;  %638 = vst.msk [vmem:[%s1265_s20 + $0x7c] sm:$0xf] %vm606_vm1, %v842_v24  ;;  %v824_v29 = vpack.c.bf16 %v402_v27, %v402_v27 }
 0x1b3   : > { %622 = vst.msk [vmem:[%s1265_s20 + $0x3c] sm:$0xf] %vm606_vm1, %v826_v26  ;;  %636 = vst.msk [vmem:[%s1265_s20 + $0x74] sm:$0xf] %vm606_vm1, %v840_v28 }
 0x1b4   : > { %620 = vst.msk [vmem:[%s1265_s20 + $0x34] sm:$0xf] %vm606_vm1, %v824_v29 }
 0x1b5 PF: > { %s16_s14 = sadd.s32 1, %s1086_s14   ;;  %s1364_s9 = smov %s1070_s10 }
 0x1b6   : > { %p13_p1 = scmp.ge.s32.totalorder %s16_s14, 4   ;;  %s1365_s10 = smov %s1074_s11 }
 0x1b7   : > { %s1366_s11 = smov %s1192_s23  ;;  %s1367_s12 = smov %s1082_s13 }
 0x1b8   : > { %s1368_s13 = smov %s1370_s22  ;;  %15 = sbr.rel (!%p13_p1) target bundleno = 5 (0x5), region = 72 }
 0x1bf   :  { %669 = vsyncpa [#allocation3], 1 }
 0x1c0   :  { %671 = vsyncpa [#allocation3 + $0x1], 1 }
 0x1c1   :  { %672 = vsyncpa [#allocation5], 1 }

</bundles_post_ra>
